<compile_context>
chip_gen: v7x
topology: tpu7x:2x2x1
jax: 0.10.0
libtpu: 0.0.40
codegen_flags: <defaults>
</compile_context>

<pallas_src>
import functools

import jax
import jax.numpy as jnp
import numpy as np
from jax import lax
from jax.experimental import pallas as pl
from jax.experimental.pallas import tpu as pltpu


def _embed_kernel(x_ref, w_ref, b_ref, o_ref, acc_ref):
    """One (batch_tile, k_tile) grid step of  out = l2norm(x @ W^T + b)."""
    k = pl.program_id(1)

    @pl.when(k == 0)
    def _():
        acc_ref[...] = jnp.zeros_like(acc_ref)

    # MXU matmul, f32 accumulation regardless of operand dtype.
    acc_ref[...] += jnp.dot(x_ref[...], w_ref[...],
                            preferred_element_type=jnp.float32)

    @pl.when(k == pl.num_programs(1) - 1)
    def _():
        y = acc_ref[...] + b_ref[...]                       # (bm, dout) f32
        # Normalize(power=2): out = y / sqrt(sum(y^2, axis=1)) -> use rsqrt (EUP).
        inv_norm = lax.rsqrt(jnp.sum(y * y, axis=1, keepdims=True))
        o_ref[...] = (y * inv_norm).astype(o_ref.dtype)


def embed_forward(x, weight, bias, *, block_b=128, block_k=512,
                  matmul_dtype=jnp.float32):
    """JAX/Pallas equivalent of Embed.forward: view -> linear -> l2norm.

    x:      (B, ...) any trailing shape, flattened to (B, dim_in)
    weight: (dim_out, dim_in)   (torch nn.Linear layout)
    bias:   (dim_out,)
    """
    B = x.shape[0]
    x2 = jnp.reshape(x, (B, -1)).astype(jnp.float32)        # x.view(B, -1)
    din = x2.shape[1]
    dout, din_w = weight.shape
    assert din == din_w, (din, din_w)

    wt = jnp.asarray(weight, jnp.float32).T                 # (din, dout)
    b2 = jnp.asarray(bias, jnp.float32).reshape(1, dout)

    # --- batch tiling: pad B up to a multiple of 8 (MXU M-dim) --------------
    Bp = ((B + 7) // 8) * 8
    if Bp <= block_b:
        bm = Bp
    else:
        bm = block_b
        Bp = pl.cdiv(B, bm) * bm
    if Bp != B:
        x2 = jnp.pad(x2, ((0, Bp - B), (0, 0)))

    # --- reduction tiling: zero-pad dim_in to a multiple of the K tile ------
    bk = min(block_k, din)
    Kp = pl.cdiv(din, bk) * bk
    if Kp != din:
        x2 = jnp.pad(x2, ((0, 0), (0, Kp - din)))
        wt = jnp.pad(wt, ((0, Kp - din), (0, 0)))

    # Optional bf16 operands for the MXU (accumulation stays f32 in scratch).
    x2 = x2.astype(matmul_dtype)
    wt = wt.astype(matmul_dtype)

    grid = (Bp // bm, Kp // bk)

    out = pl.pallas_call(
        _embed_kernel,
        out_shape=jax.ShapeDtypeStruct((Bp, dout), jnp.float32),
        grid=grid,
        in_specs=[
            pl.BlockSpec((bm, bk), lambda i, k: (i, k)),     # x tile
            pl.BlockSpec((bk, dout), lambda i, k: (k, 0)),   # W^T tile
            pl.BlockSpec((1, dout), lambda i, k: (0, 0)),    # bias (resident)
        ],
        out_specs=pl.BlockSpec((bm, dout), lambda i, k: (i, 0)),
        scratch_shapes=[pltpu.VMEM((bm, dout), jnp.float32)],
        compiler_params=pltpu.CompilerParams(
            dimension_semantics=("parallel", "arbitrary")),
    )(x2, wt, b2)

    return out[:B]


if __name__ == "__main__":
    # Small, deterministic demo shapes consistent with Embed(dim_in=1024, dim_out=128):
    # x of shape (4, 4, 16, 16) flattens to (4, 1024).
    key = jax.random.PRNGKey(0)
    B, C, H, W = 4, 4, 16, 16
    dim_in, dim_out = C * H * W, 128

    k_x, k_w, k_b = jax.random.split(key, 3)
    x = jax.random.normal(k_x, (B, C, H, W), jnp.float32)
    bound = 1.0 / np.sqrt(dim_in)
    weight = jax.random.uniform(k_w, (dim_out, dim_in), jnp.float32, -bound, bound)
    bias = jax.random.uniform(k_b, (dim_out,), jnp.float32, -bound, bound)

    out = embed_forward(x, weight, bias)
    out = jax.block_until_ready(out)

    # Pure-JAX reference mirroring the torch module exactly.
    x_flat = x.reshape(B, -1)
    y_ref = x_flat @ weight.T + bias
    norm = jnp.sqrt(jnp.sum(y_ref ** 2, axis=1, keepdims=True))
    ref = y_ref / norm

    np.testing.assert_allclose(np.asarray(out), np.asarray(ref),
                               rtol=1e-4, atol=1e-5)

    # TODO(synk): like the torch module, no epsilon is added to the L2 norm; an
    # exactly-zero linear output row would produce NaN in both implementations.
    print("KERNEL_OK")
</pallas_src>

<mosaic_0001>
module attributes {stable_mosaic.version = 11 : i64} {
  func.func @_embed_kernel(%arg0: i32, %arg1: i32, %arg2: memref<8x512xf32, #tpu.memory_space<vmem>>, %arg3: memref<512x128xf32, #tpu.memory_space<vmem>>, %arg4: memref<1x128xf32, #tpu.memory_space<vmem>>, %arg5: memref<8x128xf32, #tpu.memory_space<vmem>>, %arg6: memref<8x128xf32, #tpu.memory_space<vmem>>) attributes {dimension_semantics = [#tpu.dimension_semantics<parallel>, #tpu.dimension_semantics<arbitrary>], iteration_bounds = array<i64: 1, 2>, scalar_prefetch = 0 : i64, scratch_operands = 1 : i64, tpu.core_type = #tpu.core_type<tc>, window_params = [{transform_indices = @transform_0, window_bounds = array<i64: 8, 512>}, {transform_indices = @transform_1, window_bounds = array<i64: 512, 128>}, {pipeline_mode = #tpu.pipeline_mode<synchronous>, transform_indices = @transform_2, window_bounds = array<i64: 1, 128>}, {transform_indices = @transform_3, window_bounds = array<i64: 8, 128>}]} {
    %c0_i32 = arith.constant 0 : i32
    %0 = arith.cmpi eq, %arg1, %c0_i32 : i32
    %1 = arith.extui %0 : i1 to i32
    %c0_i32_0 = arith.constant 0 : i32
    %2 = arith.cmpi ne, %1, %c0_i32_0 : i32
    scf.if %2 {
      %cst_9 = arith.constant 0.000000e+00 : f32
      %12 = vector.broadcast %cst_9 : f32 to vector<8x128xf32>
      %c0_10 = arith.constant 0 : index
      %c0_11 = arith.constant 0 : index
      %13 = vector.load %arg6[%c0_10, %c0_11] : memref<8x128xf32, #tpu.memory_space<vmem>>, vector<8x128xf32>
      tpu.vector_store %arg6[%c0_10, %c0_11], %12 {strides = array<i32>} : memref<8x128xf32, #tpu.memory_space<vmem>>, vector<8x128xf32>,
    } else {
    }
    %c0 = arith.constant 0 : index
    %c0_1 = arith.constant 0 : index
    %3 = vector.load %arg6[%c0, %c0_1] : memref<8x128xf32, #tpu.memory_space<vmem>>, vector<8x128xf32>
    %c0_2 = arith.constant 0 : index
    %c0_3 = arith.constant 0 : index
    %4 = vector.load %arg2[%c0_2, %c0_3] : memref<8x512xf32, #tpu.memory_space<vmem>>, vector<8x512xf32>
    %c0_4 = arith.constant 0 : index
    %c0_5 = arith.constant 0 : index
    %5 = vector.load %arg3[%c0_4, %c0_5] : memref<512x128xf32, #tpu.memory_space<vmem>>, vector<512x128xf32>
    %cst = arith.constant dense<0.000000e+00> : vector<8x128xf32>
    %6 = tpu.matmul %4, %5, %cst {dimension_numbers = #tpu.dot_dimension_numbers<[1], [0], [0], [1], [0, 0, 1, 1], [], []>} : vector<8x512xf32>, vector<512x128xf32>, vector<8x128xf32> -> vector<8x128xf32>
    %7 = arith.addf %3, %6 : vector<8x128xf32>
    %c0_6 = arith.constant 0 : index
    %c0_7 = arith.constant 0 : index
    %8 = vector.load %arg6[%c0_6, %c0_7] : memref<8x128xf32, #tpu.memory_space<vmem>>, vector<8x128xf32>
    tpu.vector_store %arg6[%c0_6, %c0_7], %7 {strides = array<i32>} : memref<8x128xf32, #tpu.memory_space<vmem>>, vector<8x128xf32>,
    %c1_i32 = arith.constant 1 : i32
    %9 = arith.cmpi eq, %arg1, %c1_i32 : i32
    %10 = arith.extui %9 : i1 to i32
    %c0_i32_8 = arith.constant 0 : i32
    %11 = arith.cmpi ne, %10, %c0_i32_8 : i32
    scf.if %11 {
      %c0_9 = arith.constant 0 : index
      %c0_10 = arith.constant 0 : index
      %12 = vector.load %arg6[%c0_9, %c0_10] : memref<8x128xf32, #tpu.memory_space<vmem>>, vector<8x128xf32>
      %c0_11 = arith.constant 0 : index
      %c0_12 = arith.constant 0 : index
      %13 = vector.load %arg4[%c0_11, %c0_12] : memref<1x128xf32, #tpu.memory_space<vmem>>, vector<1x128xf32>
      %14 = vector.broadcast %13 : vector<1x128xf32> to vector<8x128xf32>
      %15 = arith.addf %12, %14 : vector<8x128xf32>
      %16 = arith.mulf %15, %15 : vector<8x128xf32>
      %cst_13 = arith.constant dense<0.000000e+00> : vector<8xf32>
      %17 = vector.multi_reduction <add>, %16, %cst_13 [1] : vector<8x128xf32> to vector<8xf32>
      %18 = vector.shape_cast %17 : vector<8xf32> to vector<8x1xf32>
      %19 = math.rsqrt %18 : vector<8x1xf32>
      %20 = vector.broadcast %19 : vector<8x1xf32> to vector<8x128xf32>
      %21 = arith.mulf %15, %20 : vector<8x128xf32>
      %c0_14 = arith.constant 0 : index
      %c0_15 = arith.constant 0 : index
      %22 = vector.load %arg5[%c0_14, %c0_15] : memref<8x128xf32, #tpu.memory_space<vmem>>, vector<8x128xf32>
      tpu.vector_store %arg5[%c0_14, %c0_15], %21 {strides = array<i32>} : memref<8x128xf32, #tpu.memory_space<vmem>>, vector<8x128xf32>,
    } else {
    }
    return
  }
  func.func @transform_0(%arg0: i32, %arg1: i32) -> (i32, i32) {
    %c0_i32 = arith.constant 0 : i32
    return %arg0, %arg1 : i32, i32
  }
  func.func @transform_1(%arg0: i32, %arg1: i32) -> (i32, i32) {
    %c0_i32 = arith.constant 0 : i32
    %c0_i32_0 = arith.constant 0 : i32
    return %arg1, %c0_i32 : i32, i32
  }
  func.func @transform_2(%arg0: i32, %arg1: i32) -> (i32, i32) {
    %c0_i32 = arith.constant 0 : i32
    %c0_i32_0 = arith.constant 0 : i32
    %c0_i32_1 = arith.constant 0 : i32
    return %c0_i32, %c0_i32_0 : i32, i32
  }
  func.func @transform_3(%arg0: i32, %arg1: i32) -> (i32, i32) {
    %c0_i32 = arith.constant 0 : i32
    %c0_i32_0 = arith.constant 0 : i32
    return %arg0, %c0_i32 : i32, i32
  }
}

</mosaic_0001>

<bundles_post_ra>
// kernel: tpu_custom_call.1
= control target key start
LH: loop header
LB: loop body
LE: loop exit
PB: predicated region body
PF: predicated region fallthrough
CT: control target
= control target key end

     0   :  { %8 = vsyncpa [#allocation4], 0  ;;  %s1244_s0 = inlined_call_operand.hbm [shape: f32[8,1024], index: 0, kind: input, shape index: {}]   ;;  %s1245_s1 = inlined_call_operand.hbm [shape: f32[1024,128], index: 1, kind: input, shape index: {}]   ;;  %s1246_s2 = inlined_call_operand.vmem [shape: f32[1,128], index: 2, kind: input, shape index: {}]   ;;  %s1247_s3 = inlined_call_operand.hbm [shape: f32[8,128], index: 3, kind: output, shape index: {}]  }
   0x1   :  { %10 = vsyncpa [#allocation4 + $0x1], 0 }
   0x2   :  { %11 = vsyncpa [#allocation7], 0 }
   0x3   :  { %13 = vsyncpa [#allocation7 + $0x1], 0 }
   0x4   :  { %14 = vsyncpa [#allocation5], 0  ;;  %s968_s12 = smov 0   ;;  %s970_s13 = smov 0  }
   0x5   :  { %s972_s14 = smov 0   ;;  %s974_s15 = smov 0  }
   0x6   :  { %s976_s16 = smov 0   ;;  %s978_s17 = smov 0  }
   0x7 LB: > { %s569_s18 = sadd.s32 4294967295, %s940_s17   ;;  %s29_s19 = sadd.s32 1, %s936_s16  ;;  %s940_s17 = sphi %s978_s17, %s20_s17   ;;  %s936_s16 = sphi %s976_s16, %s1261_s16   ;;  %s932_s15 = sphi %s974_s15, %s1260_s15   ;;  %s928_s14 = sphi %s972_s14, %s1259_s14   ;;  %s924_s13 = sphi %s970_s13, %s1258_s13   ;;  %s920_s12 = sphi %s968_s12, %s1257_s12  }
   0x8   : > { %p30_p0 = scmp.ge.s32.totalorder %s29_s19, 2  ;;  %s41_s20 = sadd.s32 1, %s928_s14 }
   0x9   : > { %p48_p1 = scmp.ne.s32.totalorder %s928_s14, %s924_s13  ;;  %p49_p2 = scmp.eq.s32.totalorder %s940_s17, 0 }
   0xa   : > { %s1263_s19 = smov (%p30_p0, %s29_s19), 0  ;;  %p54_p4 = scmp.ne.s32.totalorder %s924_s13, %s920_s12 }
   0xb   : > { %p1004_p3 = por %p49_p2, %p48_p1  ;;  %s37_s22 = ssub.s32 %s936_s16, %s1263_s19 }
   0xc   : > { %p55_p5 = scmp.eq.s32.totalorder %s569_s18, 0  ;;  %p39_p6 = scmp.eq.s32.totalorder %s37_s22, 0 }
   0xd   : > { %p739_p8 = scmp.lt.s32.totalorder %s940_s17, 2  ;;  %s1022_s25 = sand.u32 1, %s928_s14  }
   0xe   : > { %p1013_p7 = por %p55_p5, %p54_p4  ;;  %s588_s26 = sshll.u32 %s936_s16, 9 }
   0xf   : > { %s1019_s24 = scalar_select %p39_p6, %s928_s14, %s41_s20  }
  0x10   : > { %s1250_s23 = scalar_select %p1013_p7, 1, 0 }
  0x11   : > { %s572_s27 = sshll.u32 %s1022_s25, 5  ;;  %s1029_s30 = scalar_lea.hbm %s1244_s0, %s588_s26 }
  0x12   : > { %s158_s4 = scalar_lea.vmem [#allocation3], %s572_s27  ;;  %p1033_p9 = pnand %p739_p8, %p1004_p3 }
  0x13   : > { %s168_s5 = sshll.u32 %s158_s4, 4  ;;  %s155_s7 = scalar_lea.sflag [#allocation4], %s1022_s25  ;;  %s1037_s5 = int_to_ptr.vmem [resolvable:$true] %s168_s5 }
  0x14   : > { %s796_s8 = scalar_lea.hbm %s1029_s30, 512  ;;  %p798_p13 = pneg %p1033_p9 }
  0x15   : > { %p797_p12 = scmp.ne.s32.totalorder %s1029_s30, %s796_s8  ;;  %s801_s11 = scalar_lea.hbm %s1244_s0, 1024 }
  0x16   : > { %p802_p2 = scmp.lt.u32.totalorder %s1029_s30, %s1244_s0  ;;  %p803_p3 = scmp.lt.u32.totalorder %s801_s11, %s796_s8 }
  0x17   : > { %p799_p0 = pnand %p798_p13, %p797_p12  ;;  %p805_p5 = scmp.lt.u32.totalorder %s796_s8, %s1029_s30 }
  0x18   : > { %p804_p4 = por %p803_p3, %p802_p2 }
  0x19   : > { %p800_p1 = pneg %p799_p0 }
  0x1a   : > { %p806_p6 = por %p805_p5, %p804_p4 }
  0x1c   : > { %p807_p8 = pnand %p806_p6, %p800_p1 }
  0x1e   : > { %810 = shalt.err (!%p807_p8)
}
  0x1f   : > { %s811_s21 = scalar_lea.vmem %s1037_s5, 512  ;;  %s942_s22 = smov [#allocation3]  }
  0x20   : > { %p812_p12 = scmp.ne.s32.totalorder %s1037_s5, %s811_s21  ;;  %s816_s26 = sshll.u32 %s942_s22, 4  ;;  %s817_s26 = int_to_ptr.vmem [resolvable:$false] %s816_s26 }
  0x21   : > { %s818_s27 = scalar_lea.vmem %s817_s26, 1024  ;;  %p819_p11 = scmp.lt.s32.totalorder %s1037_s5, %s817_s26 }
  0x22   : > { %p814_p0 = pnand %p812_p12, %p798_p13  ;;  %p820_p2 = scmp.lt.s32.totalorder %s818_s27, %s811_s21 }
  0x24   : > { %p815_p10 = pneg %p814_p0  ;;  %p821_p3 = por %p820_p2, %p819_p11 }
  0x26   : > { %p822_p4 = pnand %p821_p3, %p815_p10 }
  0x28   : > { %825 = shalt.err (!%p822_p4)
}
  0x29   : > { %735 = dma.hbm_to_vmem [thread:$0]  (!%p1033_p9), %s1029_s30, 512, %s1037_s5, %s155_s7  }
  0x2a   : > { %p1252_p1 = scmp.lt.s32.totalorder %s940_s17, 3  ;;  %p1253_p5 = scmp.ge.s32.totalorder %s940_s17, 1 }
  0x2b   : > { %s575_s29 = sshll.u32 %s1022_s25, 9  ;;  %s589_s4 = sshll.u32 %s936_s16, 13 }
  0x2c   : > { %p1071_p6 = pnand %p1253_p5, %p1252_p1  ;;  %s1080_s10 = scalar_lea.hbm %s1245_s1, %s589_s4 }
  0x2d   : > { %s179_s11 = scalar_lea.vmem [#allocation6], %s575_s29  ;;  %s176_s30 = scalar_lea.sflag [#allocation7], %s1022_s25 }
  0x2e   : > { %s186_s12 = sshll.u32 %s179_s11, 4  ;;  %s826_s5 = scalar_lea.hbm %s1080_s10, 8192  ;;  %s1082_s12 = int_to_ptr.vmem [resolvable:$true] %s186_s12 }
  0x2f   : > { %p827_p10 = scmp.ne.s32.totalorder %s1080_s10, %s826_s5  ;;  %s831_s21 = scalar_lea.hbm %s1245_s1, 16384 }
  0x30   : > { %p832_p12 = scmp.lt.u32.totalorder %s1080_s10, %s1245_s1  ;;  %p833_p0 = scmp.lt.u32.totalorder %s831_s21, %s826_s5 }
  0x31   : > { %p829_p11 = pnand %p827_p10, %p798_p13  ;;  %p835_p3 = scmp.lt.u32.totalorder %s826_s5, %s1080_s10 }
  0x32   : > { %p834_p2 = por %p833_p0, %p832_p12 }
  0x33   : > { %p830_p8 = pneg %p829_p11 }
  0x34   : > { %p836_p4 = por %p835_p3, %p834_p2 }
  0x36   : > { %p837_p1 = pnand %p836_p4, %p830_p8 }
  0x38   : > { %840 = shalt.err (!%p837_p1)
}
  0x39   : > { %s841_s27 = scalar_lea.vmem %s1082_s12, 8192  ;;  %s943_s29 = smov [#allocation6]  }
  0x3a   : > { %p842_p5 = scmp.ne.s32.totalorder %s1082_s12, %s841_s27  ;;  %s846_s4 = sshll.u32 %s943_s29, 4  ;;  %s847_s4 = int_to_ptr.vmem [resolvable:$false] %s846_s4 }
  0x3b   : > { %s848_s8 = scalar_lea.vmem %s847_s4, 16384  ;;  %p849_p7 = scmp.lt.s32.totalorder %s1082_s12, %s847_s4 }
  0x3c   : > { %p844_p10 = pnand %p842_p5, %p798_p13  ;;  %p850_p12 = scmp.lt.s32.totalorder %s848_s8, %s841_s27 }
  0x3e   : > { %p845_p11 = pneg %p844_p10  ;;  %p851_p0 = por %p850_p12, %p849_p7 }
  0x40   : > { %p852_p2 = pnand %p851_p0, %p845_p11 }
  0x42   : > { %855 = shalt.err (!%p852_p2)
}
  0x43   : > { %s944_s9 = smov 128   ;;  %s945_s11 = smov 8  }
  0x44   : > { %738 = dma.hbm_to_vmem [thread:$0]  (!%p1033_p9), %s1080_s10, 8192, %s1082_s12, %s176_s30, %s944_s9, %s944_s9, %s945_s11  }
  0x45   : > { %198 = sbr.rel (%p1071_p6) target bundleno = 538 (0x21a), region = 32  ;;  %s200_s5 = sand.u32 (!%p1071_p6), 1, %s924_s13  }
  0x46   : > { %s579_s7 = sshll.u32 (!%p1071_p6), %s200_s5, 5  ;;  %s201_s20 = scalar_lea.sflag (!%p1071_p6), [#allocation4], %s200_s5 }
  0x47   : > { %s1113_s21 = scalar_lea.vmem (!%p1071_p6), [#allocation3], %s579_s7  ;;  %p1255_p7 = scmp.ne.s32.totalorder (!%p1071_p6), %s1250_s23, 0 }
  0x4c   : > { %907 = dma.done.wait (%p1255_p7), %s201_s20, 512  }
  0x4d   : > { %909 = vsyncadd (%p1255_p7), %s201_s20, 4294966784  ;;  %s580_s22 = sshll.u32 %s200_s5, 9  ;;  %s210_s6 = scalar_lea.sflag [#allocation7], %s200_s5 }
  0x4e   : > { %s1119_s25 = scalar_lea.vmem [#allocation6], %s580_s22 }
  0x4f   : > { %911 = dma.done.wait (%p1255_p7), %s210_s6, 8192  }
  0x50   : > { %913 = vsyncadd (%p1255_p7), %s210_s6, 4294959104  ;;  %p581_p9 = scmp.ne.s32.totalorder %s932_s15, 0 }
  0x51   : > { %v946_v0 = vmov (!%p581_p9), 0.0  }
  0x52   : > { %241 = sbr.rel (%p581_p9) target bundleno = 89 (0x59), region = 44  ;;  %242 = vst [vmem:[#allocation2] sm:$0xff] (!%p581_p9), %v946_v0 }
  0x59 PF: > { %v264_v1 = vld [vmem:[%s1119_s25 + $0x80] sm:$0xff]  ;;  %v265_v2 = vld [vmem:[%s1119_s25 + $0x88] sm:$0xff]  ;;  %v266_v12 = vld [vmem:[%s1119_s25 + $0x90] sm:$0xff]  ;;  %p582_p13 = scmp.ne.s32.totalorder %s932_s15, 1 }
  0x5a   : > { %v296_v3 = vld [vmem:[%s1119_s25 + $0x180] sm:$0xff]  ;;  %v660_v4 = vpack.c.bf16 %v265_v2, %v264_v1  ;;  %v297_v5 = vld [vmem:[%s1119_s25 + $0x188] sm:$0xff]  ;;  %v267_v14 = vld [vmem:[%s1119_s25 + $0x98] sm:$0xff] }
  0x5b   : > { %v248_v6 = vld [vmem:[%s1119_s25] sm:$0xff]  ;;  %v249_v7 = vld [vmem:[%s1119_s25 + $0x8] sm:$0xff]  ;;  %v692_v8 = vpack.c.bf16 %v297_v5, %v296_v3  ;;  %v298_v15 = vld [vmem:[%s1119_s25 + $0x190] sm:$0xff]  ;;  %v664_v17 = vpack.c.bf16 %v267_v14, %v266_v12 }
  0x5c   : > { %v662_v9 = vpack.c.bf16 %v249_v7, %v248_v6  ;;  %v280_v10 = vld [vmem:[%s1119_s25 + $0x100] sm:$0xff]  ;;  %v281_v11 = vld [vmem:[%s1119_s25 + $0x108] sm:$0xff]  ;;  %661 = vmatprep.subr.bf16.mxu0 %v660_v4  ;;  %v299_v16 = vld [vmem:[%s1119_s25 + $0x198] sm:$0xff] }
  0x5d   : > { %v694_v13 = vpack.c.bf16 %v281_v11, %v280_v10  ;;  %693 = vmatprep.subr.bf16.mxu1 %v692_v8  ;;  %v696_v18 = vpack.c.bf16 %v299_v16, %v298_v15  ;;  %v250_v19 = vld [vmem:[%s1119_s25 + $0x10] sm:$0xff]  ;;  %v251_v20 = vld [vmem:[%s1119_s25 + $0x18] sm:$0xff]  ;;  %v268_v24 = vld [vmem:[%s1119_s25 + $0xa0] sm:$0xff] }
  0x5e   : > { %663 = vmatpush3.bf16.msra.mxu0 %v662_v9  ;;  %v282_v21 = vld [vmem:[%s1119_s25 + $0x110] sm:$0xff]  ;;  %v666_v22 = vpack.c.bf16 %v251_v20, %v250_v19  ;;  %v283_v23 = vld [vmem:[%s1119_s25 + $0x118] sm:$0xff]  ;;  %v269_v25 = vld [vmem:[%s1119_s25 + $0xa8] sm:$0xff] }
  0x5f   : > { %695 = vmatpush3.bf16.msra.mxu1 %v694_v13  ;;  %665 = vmatprep.subr.bf16.mxu0 %v664_v17  ;;  %v698_v26 = vpack.c.bf16 %v283_v23, %v282_v21  ;;  %v668_v27 = vpack.c.bf16 %v269_v25, %v268_v24  ;;  %v300_v28 = vld [vmem:[%s1119_s25 + $0x1a0] sm:$0xff]  ;;  %v301_v29 = vld [vmem:[%s1119_s25 + $0x1a8] sm:$0xff]  ;;  %v270_v36 = vld [vmem:[%s1119_s25 + $0xb0] sm:$0xff] }
  0x60   : > { %697 = vmatprep.subr.bf16.mxu1 %v696_v18  ;;  %v252_v30 = vld [vmem:[%s1119_s25 + $0x20] sm:$0xff]  ;;  %v700_v31 = vpack.c.bf16 %v301_v29, %v300_v28  ;;  %v253_v32 = vld [vmem:[%s1119_s25 + $0x28] sm:$0xff]  ;;  %v271_v37 = vld [vmem:[%s1119_s25 + $0xb8] sm:$0xff] }
  0x61   : > { %v284_v33 = vld [vmem:[%s1119_s25 + $0x120] sm:$0xff]  ;;  %v285_v34 = vld [vmem:[%s1119_s25 + $0x128] sm:$0xff]  ;;  %v670_v35 = vpack.c.bf16 %v253_v32, %v252_v30  ;;  %v302_v38 = vld [vmem:[%s1119_s25 + $0x1b0] sm:$0xff]  ;;  %v672_v40 = vpack.c.bf16 %v271_v37, %v270_v36 }
  0x62   : > { %667 = vmatpush3.bf16.msra.mxu0 %v666_v22  ;;  %v702_v39 = vpack.c.bf16 %v285_v34, %v284_v33  ;;  %v303_v41 = vld [vmem:[%s1119_s25 + $0x1b8] sm:$0xff]  ;;  %v254_v42 = vld [vmem:[%s1119_s25 + $0x30] sm:$0xff]  ;;  %v272_v47 = vld [vmem:[%s1119_s25 + $0xc0] sm:$0xff] }
  0x63   : > { %699 = vmatpush3.bf16.msra.mxu1 %v698_v26  ;;  %669 = vmatprep.subr.bf16.mxu0 %v668_v27  ;;  %v255_v43 = vld [vmem:[%s1119_s25 + $0x38] sm:$0xff]  ;;  %v704_v44 = vpack.c.bf16 %v303_v41, %v302_v38  ;;  %v286_v45 = vld [vmem:[%s1119_s25 + $0x130] sm:$0xff]  ;;  %v273_v48 = vld [vmem:[%s1119_s25 + $0xc8] sm:$0xff] }
  0x64   : > { %701 = vmatprep.subr.bf16.mxu1 %v700_v31  ;;  %v287_v46 = vld [vmem:[%s1119_s25 + $0x138] sm:$0xff]  ;;  %v304_v49 = vld [vmem:[%s1119_s25 + $0x1c0] sm:$0xff]  ;;  %v305_v50 = vld [vmem:[%s1119_s25 + $0x1c8] sm:$0xff]  ;;  %v674_v51 = vpack.c.bf16 %v255_v43, %v254_v42  ;;  %v676_v53 = vpack.c.bf16 %v273_v48, %v272_v47 }
  0x65   : > { %v706_v52 = vpack.c.bf16 %v287_v46, %v286_v45  ;;  %v256_v54 = vld [vmem:[%s1119_s25 + $0x40] sm:$0xff]  ;;  %v257_v55 = vld [vmem:[%s1119_s25 + $0x48] sm:$0xff]  ;;  %v708_v57 = vpack.c.bf16 %v305_v50, %v304_v49  ;;  %v274_v59 = vld [vmem:[%s1119_s25 + $0xd0] sm:$0xff] }
  0x66   : > { %671 = vmatpush3.bf16.msra.mxu0 %v670_v35  ;;  %v288_v56 = vld [vmem:[%s1119_s25 + $0x140] sm:$0xff]  ;;  %v289_v58 = vld [vmem:[%s1119_s25 + $0x148] sm:$0xff]  ;;  %v275_v60 = vld [vmem:[%s1119_s25 + $0xd8] sm:$0xff]  ;;  %v678_v63 = vpack.c.bf16 %v257_v55, %v256_v54 }
  0x67   : > { %703 = vmatpush3.bf16.msra.mxu1 %v702_v39  ;;  %673 = vmatprep.subr.bf16.mxu0 %v672_v40  ;;  %v306_v61 = vld [vmem:[%s1119_s25 + $0x1d0] sm:$0xff]  ;;  %v307_v62 = vld [vmem:[%s1119_s25 + $0x1d8] sm:$0xff]  ;;  %v710_v0 = vpack.c.bf16 %v289_v58, %v288_v56  ;;  %v680_v1 = vpack.c.bf16 %v275_v60, %v274_v59  ;;  %v276_v7 = vld [vmem:[%s1119_s25 + $0xe0] sm:$0xff] }
  0x68   : > { %705 = vmatprep.subr.bf16.mxu1 %v704_v44  ;;  %v258_v2 = vld [vmem:[%s1119_s25 + $0x50] sm:$0xff]  ;;  %v259_v3 = vld [vmem:[%s1119_s25 + $0x58] sm:$0xff]  ;;  %v712_v5 = vpack.c.bf16 %v307_v62, %v306_v61  ;;  %v277_v8 = vld [vmem:[%s1119_s25 + $0xe8] sm:$0xff] }
  0x69   : > { %v290_v4 = vld [vmem:[%s1119_s25 + $0x150] sm:$0xff]  ;;  %v291_v6 = vld [vmem:[%s1119_s25 + $0x158] sm:$0xff]  ;;  %v308_v9 = vld [vmem:[%s1119_s25 + $0x1e0] sm:$0xff]  ;;  %v682_v11 = vpack.c.bf16 %v259_v3, %v258_v2  ;;  %v684_v15 = vpack.c.bf16 %v277_v8, %v276_v7 }
  0x6a   : > { %675 = vmatpush3.bf16.msra.mxu0 %v674_v51  ;;  %v309_v10 = vld [vmem:[%s1119_s25 + $0x1e8] sm:$0xff]  ;;  %v260_v12 = vld [vmem:[%s1119_s25 + $0x60] sm:$0xff]  ;;  %v714_v14 = vpack.c.bf16 %v291_v6, %v290_v4  ;;  %v247_v18 = vld [vmem:[%s1113_s21 + $0x18] sm:$0xff] }
  0x6b   : > { %707 = vmatpush3.bf16.msra.mxu1 %v706_v52  ;;  %677 = vmatprep.subr.bf16.mxu0 %v676_v53  ;;  %v261_v13 = vld [vmem:[%s1119_s25 + $0x68] sm:$0xff]  ;;  %v292_v16 = vld [vmem:[%s1119_s25 + $0x160] sm:$0xff]  ;;  %v716_v19 = vpack.c.bf16 %v309_v10, %v308_v9  ;;  %v278_v21 = vld [vmem:[%s1119_s25 + $0xf0] sm:$0xff] }
  0x6c   : > { %709 = vmatprep.subr.bf16.mxu1 %v708_v57  ;;  %v245_v17 = vld [vmem:[%s1113_s21 + $0x8] sm:$0xff]  ;;  %v279_v22 = vld [vmem:[%s1119_s25 + $0xf8] sm:$0xff]  ;;  %v310_v23 = vld [vmem:[%s1119_s25 + $0x1f0] sm:$0xff]  ;;  %446 = vmatprep.mubr.f32.mxu1 %v247_v18  ;;  %v686_v25 = vpack.c.bf16 %v261_v13, %v260_v12 }
  0x6d   : > { %v293_v20 = vld [vmem:[%s1119_s25 + $0x168] sm:$0xff]  ;;  %376 = vmatprep.mubr.f32.mxu0 %v245_v17  ;;  %v311_v24 = vld [vmem:[%s1119_s25 + $0x1f8] sm:$0xff]  ;;  %v688_v27 = vpack.c.bf16 %v279_v22, %v278_v21  ;;  %v262_v28 = vld [vmem:[%s1119_s25 + $0x70] sm:$0xff] }
  0x6e   : > { %679 = vmatpush3.bf16.msra.mxu0 %v678_v63  ;;  %v718_v26 = vpack.c.bf16 %v293_v20, %v292_v16  ;;  %v263_v29 = vld [vmem:[%s1119_s25 + $0x78] sm:$0xff]  ;;  %v720_v30 = vpack.c.bf16 %v311_v24, %v310_v23  ;;  %v294_v31 = vld [vmem:[%s1119_s25 + $0x170] sm:$0xff]  ;;  %v244_v35 = vld [vmem:[%s1113_s21] sm:$0xff] }
  0x6f   : > { %711 = vmatpush3.bf16.msra.mxu1 %v710_v0  ;;  %681 = vmatprep.subr.bf16.mxu0 %v680_v1  ;;  %v295_v32 = vld [vmem:[%s1119_s25 + $0x178] sm:$0xff]  ;;  %v690_v33 = vpack.c.bf16 %v263_v29, %v262_v28  ;;  %v246_v36 = vld [vmem:[%s1113_s21 + $0x10] sm:$0xff] }
  0x70   : > { %713 = vmatprep.subr.bf16.mxu1 %v712_v5  ;;  %v722_v34 = vpack.c.bf16 %v295_v32, %v294_v31  ;;  %v243_v43 = vld [vmem:[#allocation2] sm:$0xff] }
  0x71   : > { %v583_v47 = vld [vmem:[%s1246_s2] ss:$0 sm:$0xff] (!%p582_p13) }
  0x72   : > { %683 = vmatpush3.bf16.msra.mxu0 %v682_v11 }
  0x73   : > { %715 = vmatpush3.bf16.msra.mxu1 %v714_v14  ;;  %685 = vmatprep.subr.bf16.mxu0 %v684_v15 }
  0x74   : > { %717 = vmatprep.subr.bf16.mxu1 %v716_v19 }
  0x76   : > { %687 = vmatpush3.bf16.msra.mxu0 %v686_v25 }
  0x77   : > { %719 = vmatpush3.bf16.msra.mxu1 %v718_v26  ;;  %689 = vmatprep.subr.bf16.mxu0 %v688_v27 }
  0x78   : > { %721 = vmatprep.subr.bf16.mxu1 %v720_v30 }
  0x7a   : > { %691 = vmatpush3.bf16.msra.mxu0 %v690_v33 }
  0x7b   : > { %723 = vmatpush3.bf16.msra.mxu1 %v722_v34 }
  0x7d   : > { %377 = vmatmul.mubr.f32.vlgmr.msra.gmra.mrb[0].mxu0 %v244_v35 }
  0x7e   : > { %447 = vmatmul.mubr.f32.vlgmr.msra.gmra.mrb[0].mxu1 %v246_v36 }
 0x150   : > { %v622_v37 = vpop.f32.mrb[0].mxu0 }
 0x151   : > { %v657_v38 = vpop.f32.mrb[0].mxu1  ;;  %v623_v39 = vpop.f32.mrb[1].mxu0 }
 0x152   : > { %v624_v40 = vadd.f32 %v623_v39, %v622_v37  ;;  %v658_v41 = vpop.f32.mrb[1].mxu1 }
 0x153   : > { %v659_v42 = vadd.f32 %v658_v41, %v657_v38  ;;  %457 = sbr.rel (%p582_p13) target bundleno = 513 (0x201), region = 48 }
 0x155   : > { %v449_v44 = vadd.f32 %v659_v42, %v624_v40 }
 0x157   : > { %v452_v45 = vadd.f32 %v449_v44, %v243_v43 }
 0x159   : > { %453 = vst [vmem:[#allocation2] sm:$0xff] %v452_v45 }
 0x160   : > { %v458_v46 = vld [vmem:[#allocation2] sm:$0xff] }
 0x161   : > { %v466_v48 = vadd.f32 %v583_v47, %v458_v46 }
 0x163   : > { %v467_v49 = vmul.f32 %v466_v48, %v466_v48 }
 0x165   : > { %468 = vadd.xlane.f32.xlu0 %v467_v49 }
 0x1f2   : > { %v469_v50 = vpop.xlane.xlu0 %468 }
 0x1f3   : > { %794 = vrsqrt.f32 %v469_v50 }
 0x1fd   : > { %v795_v51 = vpop.eup %794 }
 0x1fe   : > { %v471_v52 = vmul.f32 %v795_v51, %v466_v48 }
 0x200   : > { %472 = vst [vmem:[#allocation8] sm:$0xff] %v471_v52 }
 0x201 PF: > { %p1200_p6 = scmp.eq.s32.totalorder %s569_s18, 1  ;;  %s947_s15 = smov [#allocation8]  }
 0x202   : > { %s482_s12 = sshll.u32 %s947_s15, 4  ;;  %s483_s12 = int_to_ptr.vmem [resolvable:$true] %s482_s12 }
 0x203   : > { %s856_s30 = scalar_lea.vmem %s483_s12, 128  ;;  %p863_p1 = scmp.lt.s32.totalorder %s483_s12, %s483_s12 }
 0x204   : > { %p857_p8 = scmp.ne.s32.totalorder %s483_s12, %s856_s30  ;;  %p864_p5 = scmp.lt.s32.totalorder %s856_s30, %s856_s30 }
 0x206   : > { %p858_p3 = pnand %p857_p8, %p1200_p6  ;;  %p865_p10 = por %p864_p5, %p863_p1 }
 0x208   : > { %p859_p4 = pneg %p858_p3 }
 0x20a   : > { %p866_p11 = pnand %p865_p10, %p859_p4 }
 0x20c   : > { %869 = shalt.err (!%p866_p11)
}
 0x20d   : > { %s870_s18 = scalar_lea.hbm %s1247_s3, 128 }
 0x20e   : > { %p871_p12 = scmp.ne.s32.totalorder %s1247_s3, %s870_s18  ;;  %p876_p7 = scmp.lt.u32.totalorder %s870_s18, %s1247_s3 }
 0x210   : > { %p872_p0 = pnand %p871_p12, %p1200_p6 }
 0x212   : > { %p873_p2 = pneg %p872_p0 }
 0x214   : > { %p878_p9 = pnand %p876_p7, %p873_p2 }
 0x216   : > { %881 = shalt.err (!%p878_p9)
}
 0x217   : > { %729 = dma.vmem_to_hbm [thread:$0]  (%p1200_p6), %s483_s12, 128, %s1247_s3, [#allocation5]  }
 0x218   : > { %915 = dma.done.wait (%p1200_p6), [#allocation5], 128  }
 0x219   : > { %917 = vsyncadd (%p1200_p6), [#allocation5], 4294967168 }
 0x21a PF: > { %s20_s17 = sadd.s32 1, %s940_s17   ;;  %s1257_s12 = smov %s924_s13 }
 0x21b   : > { %p17_p13 = scmp.ge.s32.totalorder %s20_s17, 4   ;;  %s1258_s13 = smov %s928_s14 }
 0x21c   : > { %s1259_s14 = smov %s1019_s24  ;;  %s1260_s15 = smov %s936_s16 }
 0x21d   : > { %s1261_s16 = smov %s1263_s19  ;;  %19 = sbr.rel (!%p17_p13) target bundleno = 7 (0x7), region = 91 }
 0x224   :  { %495 = vsyncpa [#allocation4], 1 }
 0x225   :  { %497 = vsyncpa [#allocation4 + $0x1], 1 }
 0x226   :  { %498 = vsyncpa [#allocation7], 1 }
 0x227   :  { %500 = vsyncpa [#allocation7 + $0x1], 1 }
 0x228   :  { %501 = vsyncpa [#allocation5], 1 }
 0x229   :  { %503 = vsyncpa [#allocation5 + $0x1], 1 }

</bundles_post_ra>
